<compile_context>
chip_gen: v7x
topology: tpu7x:2x2x1
jax: 0.10.0
libtpu: 0.0.40
codegen_flags: <defaults>
</compile_context>

<pallas_src>
import functools

import jax
import jax.numpy as jnp
from jax.experimental import pallas as pl
from jax.experimental.pallas import tpu as pltpu

_LANES = 128
_MIN_SPLIT_BYTES = 2 * 1024 * 1024   # force a multi-step grid above this slab size
_MIN_GRID_STEPS = 4                  # >= 2 * num_cores (v7x megacore) + pipeline depth


def _sublane(dtype):
    # Natural sublane packing: f32 -> 8, bf16 -> 16, int8/fp8 -> 32.
    return max(8, 32 // jnp.dtype(dtype).itemsize)


def _vmem_budget():
    """Generation-aware (max_block_bytes, vmem_limit_bytes).

    v7x: 64 MiB VMEM/TC, ~3.2 TB/s HBM -> 8 MiB blocks cut per-step overhead to
    ~6% of roofline while 2x double-buffered in+out (32 MiB) + scratch fits a
    56 MiB limit.  v5e/v6e: 128 MiB physical VMEM -> same 8 MiB block with a
    96 MiB limit (the mem-bound plateau is already reached near 4 MiB there).
    """
    phys = 64 * 1024 * 1024            # conservative fallback: v7x per-TC VMEM
    try:
        info = pltpu.get_tpu_info()
        cap = int(getattr(info, "vmem_capacity_bytes", 0) or 0)
        if cap > 0:
            phys = cap
    except Exception:
        pass
    block = 8 * 1024 * 1024
    limit = max(32 * 1024 * 1024, min(96 * 1024 * 1024, phys - 8 * 1024 * 1024))
    return block, limit


def _choose_row_tile(n_rows, row_bytes, dtype, max_block_bytes):
    """Largest row tile under the block budget, but never a tiny grid for big slabs."""
    sub = _sublane(dtype)
    tile = max(sub, (max_block_bytes // max(row_bytes, 1)) // sub * sub)
    total_bytes = n_rows * row_bytes
    if total_bytes > _MIN_SPLIT_BYTES:
        # Guarantee >= _MIN_GRID_STEPS steps: with grid=1 there is no DMA/compute
        # overlap and on v7x a single "parallel" step cannot be split across the
        # two TensorCores.
        cap = (n_rows // _MIN_GRID_STEPS) // sub * sub
        if cap >= sub:
            tile = min(tile, cap)
    if n_rows <= tile:
        # Single (small) block: block dim == full array dim is always legal.
        return n_rows, 1
    return tile, pl.cdiv(n_rows, tile)


def _layernorm_kernel(x_ref, gamma_ref, beta_ref, o_ref, *, epsilon):
    """General path (hidden >= 128, or non-packable): fused single reduction pass."""
    x = x_ref[...].astype(jnp.float32)                        # (T, H)
    # One pass over x for both moments; var = E[x^2] - mean^2 (clamped at 0).
    mean = jnp.mean(x, axis=-1, keepdims=True)                # (T, 1)
    mean_sq = jnp.mean(x * x, axis=-1, keepdims=True)         # (T, 1)
    variance = jnp.maximum(mean_sq - mean * mean, 0.0)
    # Exact module semantics: std = (variance + eps) ** 2  (squared, no sqrt).
    # Narrow (T,1) reciprocal (EUP slot) + broadcast multiply; approx=False keeps
    # the 1e-5 tolerance (1/(var+eps)^2 amplifies error ~2x vs 1/sqrt).
    inv_std = pl.reciprocal((variance + epsilon) ** 2, approx=False)
    shift = mean * inv_std                                    # (T, 1)
    gamma = gamma_ref[...].astype(jnp.float32)                # (1, H)
    beta = beta_ref[...].astype(jnp.float32)
    # Mean folded into the output pass: centered x is never materialized.
    o_ref[...] = ((x * inv_std - shift) * gamma + beta).astype(o_ref.dtype)


def _layernorm_packed_kernel(x_ref, gamma_ref, beta_ref, seg_ref, o_ref, *,
                             epsilon, hidden):
    """Lane-dense path for hidden < 128: `pack` logical rows per 128-lane row.

    Segmented first/second moments are computed on the (otherwise idle) MXU:
    x @ S, where S is a block-diagonal 0/1 matrix, places every segment's sum on
    all of that segment's own lanes.  All remaining work is full-lane VPU ops
    and a single unmasked store.
    """
    x = x_ref[...].astype(jnp.float32)                        # (T, pack*hidden)
    seg = seg_ref[...]                                        # (128, 128) 0/1, f32

    def seg_sum(v):
        # Split v into an exactly-bf16 "hi" part + small residual so the segment
        # sums stay ~f32-accurate even if the matmul evaluates inputs at bf16
        # precision; accumulation is f32 either way (preferred_element_type).
        v_hi = v.astype(jnp.bfloat16).astype(jnp.float32)
        v_lo = v - v_hi
        return (jnp.dot(v_hi, seg, preferred_element_type=jnp.float32)
                + jnp.dot(v_lo, seg, preferred_element_type=jnp.float32))

    inv_h = 1.0 / float(hidden)
    mean = seg_sum(x) * inv_h                                 # (T, 128) per-segment
    mean_sq = seg_sum(x * x) * inv_h
    variance = jnp.maximum(mean_sq - mean * mean, 0.0)
    inv_std = pl.reciprocal((variance + epsilon) ** 2, approx=False)
    gamma = gamma_ref[...].astype(jnp.float32)                # (1, 128) tiled
    beta = beta_ref[...].astype(jnp.float32)
    o_ref[...] = ((x - mean) * inv_std * gamma + beta).astype(o_ref.dtype)


def layer_norm(x, gamma, beta, *, epsilon=1e-12, max_block_bytes=None,
               vmem_limit_bytes=None):
    """x: (..., hidden); gamma, beta: (hidden,). Matches the PyTorch forward exactly."""
    orig_shape = x.shape
    hidden = orig_shape[-1]
    dtype = x.dtype

    default_block, default_limit = _vmem_budget()
    if max_block_bytes is None:
        max_block_bytes = default_block
    if vmem_limit_bytes is None:
        vmem_limit_bytes = default_limit

    x2d = x.reshape(-1, hidden)
    n_rows = x2d.shape[0]

    # Lane-dense packing for tiny hidden: fold `pack` logical rows into one
    # 128-lane physical row so stores are unmasked full-lane vst.
    pack = 1
    if hidden < _LANES and _LANES % hidden == 0:
        pack = _LANES // hidden

    if pack > 1:
        # Pad rows (cheap fused XLA pad) so the packed path is ALWAYS taken and
        # physical rows stay sublane-aligned; padded rows are sliced off after.
        align = pack * _sublane(dtype)
        pad_rows = (-n_rows) % align
        x_pad = jnp.pad(x2d, ((0, pad_rows), (0, 0))) if pad_rows else x2d
        phys_rows = (n_rows + pad_rows) // pack
        phys_hidden = pack * hidden
        x_in = x_pad.reshape(phys_rows, phys_hidden)
        gamma_in = jnp.tile(gamma, pack).reshape(1, phys_hidden)
        beta_in = jnp.tile(beta, pack).reshape(1, phys_hidden)
        # Constant block-diagonal segment matrix: S[i, j] = 1 iff lanes i, j
        # belong to the same logical row.  Resident (constant block index).
        lane_seg = jnp.arange(phys_hidden) // hidden
        seg = (lane_seg[:, None] == lane_seg[None, :]).astype(jnp.float32)
        kernel = functools.partial(_layernorm_packed_kernel,
                                   epsilon=epsilon, hidden=hidden)
        extra_inputs = (seg,)
        extra_specs = [pl.BlockSpec((phys_hidden, phys_hidden), lambda i: (0, 0))]
    else:
        pad_rows = 0
        phys_rows = n_rows
        phys_hidden = hidden
        x_in = x2d
        gamma_in = gamma.reshape(1, hidden)
        beta_in = beta.reshape(1, hidden)
        kernel = functools.partial(_layernorm_kernel, epsilon=epsilon)
        extra_inputs = ()
        extra_specs = []

    # Budget the tile in f32-working bytes so bf16 inputs (whose in-kernel f32
    # temporaries double the footprint) still fit comfortably in VMEM.
    work_row_bytes = phys_hidden * 4
    row_tile, grid = _choose_row_tile(phys_rows, work_row_bytes, dtype,
                                      max_block_bytes)

    out2d = pl.pallas_call(
        kernel,
        out_shape=jax.ShapeDtypeStruct((phys_rows, phys_hidden), dtype),
        grid_spec=pltpu.PrefetchScalarGridSpec(
            num_scalar_prefetch=0,
            grid=(grid,),                                     # no wrapper row padding (ragged OK)
            in_specs=[
                pl.BlockSpec((row_tile, phys_hidden), lambda i: (i, 0)),
                # Constant block index -> gamma/beta (and S) stay resident.
                pl.BlockSpec((1, phys_hidden), lambda i: (0, 0)),
                pl.BlockSpec((1, phys_hidden), lambda i: (0, 0)),
            ] + extra_specs,
            out_specs=pl.BlockSpec((row_tile, phys_hidden), lambda i: (i, 0)),
        ),
        compiler_params=pltpu.CompilerParams(
            dimension_semantics=("parallel",),
            vmem_limit_bytes=vmem_limit_bytes,
        ),
    )(x_in, gamma_in, beta_in, *extra_inputs)

    if pack > 1:
        out2d = out2d.reshape(-1, hidden)
        if pad_rows:
            out2d = out2d[:n_rows]
    return out2d.reshape(orig_shape)


def layer_norm_ref(x, gamma, beta, epsilon=1e-12):
    """Pure-JAX reference mirroring the PyTorch forward exactly."""
    mean = jnp.mean(x, axis=-1, keepdims=True)
    out = x - mean
    variance = jnp.mean(out ** 2, axis=-1, keepdims=True)
    std = (variance + epsilon) ** 2
    out = out / std * gamma + beta
    return out


if __name__ == "__main__":
    # Module config: LayerNorm(input_dim=32) -> center=True, scale=True,
    # epsilon=1e-12, conditional=False.
    batch, seq, hidden = 2, 8, 32

    key = jax.random.PRNGKey(0)
    x = jax.random.normal(key, (batch, seq, hidden), dtype=jnp.float32)

    # Deterministic parameter init, matching nn.Parameter(zeros)/(ones) in __init__.
    beta = jnp.zeros((hidden,), dtype=jnp.float32)
    gamma = jnp.ones((hidden,), dtype=jnp.float32)

    out = jax.block_until_ready(layer_norm(x, gamma, beta, epsilon=1e-12))
    ref = layer_norm_ref(x, gamma, beta, epsilon=1e-12)
    assert out.shape == x.shape and out.dtype == x.dtype
    assert jnp.allclose(out, ref, rtol=1e-5, atol=1e-5), "mismatch (packed MXU path)"

    k1, k2 = jax.random.split(key)

    # Check 1: lane-dense hidden (general fused path, single small block).
    h2 = 256
    x2 = jax.random.normal(k1, (2, 8, h2), dtype=jnp.float32)
    g2 = jax.random.normal(k2, (h2,), dtype=jnp.float32)
    b2 = jnp.full((h2,), 0.5, dtype=jnp.float32)
    o2 = jax.block_until_ready(layer_norm(x2, g2, b2, epsilon=1e-12))
    assert jnp.allclose(o2, layer_norm_ref(x2, g2, b2), rtol=1e-5, atol=1e-5), \
        "mismatch (general path)"

    # Check 2: ragged last block handled without any wrapper row padding
    # (force a small tile so grid = cdiv(50, 16) = 4 with a partial final block).
    x3 = jax.random.normal(k2, (50, h2), dtype=jnp.float32)
    o3 = jax.block_until_ready(layer_norm(x3, g2, b2, epsilon=1e-12,
                                          max_block_bytes=16 * 1024))
    assert jnp.allclose(o3, layer_norm_ref(x3, g2, b2), rtol=1e-5, atol=1e-5), \
        "mismatch (ragged path)"

    # Check 3: >2 MiB slab is forced to a multi-step grid (pipelining / megacore).
    x4 = jax.random.normal(k1, (4096, h2), dtype=jnp.float32)
    o4 = jax.block_until_ready(layer_norm(x4, g2, b2, epsilon=1e-12))
    assert jnp.allclose(o4, layer_norm_ref(x4, g2, b2), rtol=1e-5, atol=1e-5), \
        "mismatch (multi-step grid path)"

    # Check 4: tiny hidden with n_rows not a multiple of pack -> rows are padded
    # so the packed lane-dense path is still used (no masked-store fallback).
    g5 = jax.random.normal(k2, (hidden,), dtype=jnp.float32)
    b5 = jnp.full((hidden,), -0.25, dtype=jnp.float32)
    x5 = jax.random.normal(k2, (7, hidden), dtype=jnp.float32)
    o5 = jax.block_until_ready(layer_norm(x5, g5, b5, epsilon=1e-12))
    assert jnp.allclose(o5, layer_norm_ref(x5, g5, b5), rtol=1e-5, atol=1e-5), \
        "mismatch (packed + row-padding path)"

    print("KERNEL_OK")
</pallas_src>

<mosaic_0001>
module attributes {stable_mosaic.version = 11 : i64} {
  func.func @_layernorm_packed_kernel(%arg0: i32, %arg1: memref<8x128xf32, #tpu.memory_space<vmem>>, %arg2: memref<1x128xf32, #tpu.memory_space<vmem>>, %arg3: memref<1x128xf32, #tpu.memory_space<vmem>>, %arg4: memref<128x128xf32, #tpu.memory_space<vmem>>, %arg5: memref<8x128xf32, #tpu.memory_space<vmem>>) attributes {dimension_semantics = [#tpu.dimension_semantics<parallel>], iteration_bounds = array<i64: 1>, scalar_prefetch = 0 : i64, scratch_operands = 0 : i64, tpu.core_type = #tpu.core_type<tc>, window_params = [{transform_indices = @transform_0, window_bounds = array<i64: 8, 128>}, {pipeline_mode = #tpu.pipeline_mode<synchronous>, transform_indices = @transform_1, window_bounds = array<i64: 1, 128>}, {pipeline_mode = #tpu.pipeline_mode<synchronous>, transform_indices = @transform_2, window_bounds = array<i64: 1, 128>}, {pipeline_mode = #tpu.pipeline_mode<synchronous>, transform_indices = @transform_3, window_bounds = array<i64: 128, 128>}, {transform_indices = @transform_4, window_bounds = array<i64: 8, 128>}]} {
    %c0 = arith.constant 0 : index
    %c0_0 = arith.constant 0 : index
    %0 = vector.load %arg1[%c0, %c0_0] : memref<8x128xf32, #tpu.memory_space<vmem>>, vector<8x128xf32>
    %c0_1 = arith.constant 0 : index
    %c0_2 = arith.constant 0 : index
    %1 = vector.load %arg4[%c0_1, %c0_2] : memref<128x128xf32, #tpu.memory_space<vmem>>, vector<128x128xf32>
    %2 = arith.truncf %0 : vector<8x128xf32> to vector<8x128xbf16>
    %3 = arith.extf %2 : vector<8x128xbf16> to vector<8x128xf32>
    %4 = arith.subf %0, %3 : vector<8x128xf32>
    %cst = arith.constant dense<0.000000e+00> : vector<8x128xf32>
    %5 = tpu.matmul %3, %1, %cst {dimension_numbers = #tpu.dot_dimension_numbers<[1], [0], [0], [1], [0, 0, 1, 1], [], []>} : vector<8x128xf32>, vector<128x128xf32>, vector<8x128xf32> -> vector<8x128xf32>
    %cst_3 = arith.constant dense<0.000000e+00> : vector<8x128xf32>
    %6 = tpu.matmul %4, %1, %cst_3 {dimension_numbers = #tpu.dot_dimension_numbers<[1], [0], [0], [1], [0, 0, 1, 1], [], []>} : vector<8x128xf32>, vector<128x128xf32>, vector<8x128xf32> -> vector<8x128xf32>
    %7 = arith.addf %5, %6 : vector<8x128xf32>
    %cst_4 = arith.constant 3.125000e-02 : f32
    %8 = vector.broadcast %cst_4 : f32 to vector<8x128xf32>
    %9 = arith.mulf %7, %8 : vector<8x128xf32>
    %10 = arith.mulf %0, %0 : vector<8x128xf32>
    %11 = arith.truncf %10 : vector<8x128xf32> to vector<8x128xbf16>
    %12 = arith.extf %11 : vector<8x128xbf16> to vector<8x128xf32>
    %13 = arith.subf %10, %12 : vector<8x128xf32>
    %cst_5 = arith.constant dense<0.000000e+00> : vector<8x128xf32>
    %14 = tpu.matmul %12, %1, %cst_5 {dimension_numbers = #tpu.dot_dimension_numbers<[1], [0], [0], [1], [0, 0, 1, 1], [], []>} : vector<8x128xf32>, vector<128x128xf32>, vector<8x128xf32> -> vector<8x128xf32>
    %cst_6 = arith.constant dense<0.000000e+00> : vector<8x128xf32>
    %15 = tpu.matmul %13, %1, %cst_6 {dimension_numbers = #tpu.dot_dimension_numbers<[1], [0], [0], [1], [0, 0, 1, 1], [], []>} : vector<8x128xf32>, vector<128x128xf32>, vector<8x128xf32> -> vector<8x128xf32>
    %16 = arith.addf %14, %15 : vector<8x128xf32>
    %cst_7 = arith.constant 3.125000e-02 : f32
    %17 = vector.broadcast %cst_7 : f32 to vector<8x128xf32>
    %18 = arith.mulf %16, %17 : vector<8x128xf32>
    %19 = arith.mulf %9, %9 : vector<8x128xf32>
    %20 = arith.subf %18, %19 : vector<8x128xf32>
    %cst_8 = arith.constant 0.000000e+00 : f32
    %21 = vector.broadcast %cst_8 : f32 to vector<8x128xf32>
    %22 = arith.maximumf %20, %21 : vector<8x128xf32>
    %cst_9 = arith.constant 9.99999996E-13 : f32
    %23 = vector.broadcast %cst_9 : f32 to vector<8x128xf32>
    %24 = arith.addf %22, %23 : vector<8x128xf32>
    %25 = arith.mulf %24, %24 : vector<8x128xf32>
    %26 = tpu.reciprocal %25 : vector<8x128xf32> -> vector<8x128xf32>
    %c0_10 = arith.constant 0 : index
    %c0_11 = arith.constant 0 : index
    %27 = vector.load %arg2[%c0_10, %c0_11] : memref<1x128xf32, #tpu.memory_space<vmem>>, vector<1x128xf32>
    %c0_12 = arith.constant 0 : index
    %c0_13 = arith.constant 0 : index
    %28 = vector.load %arg3[%c0_12, %c0_13] : memref<1x128xf32, #tpu.memory_space<vmem>>, vector<1x128xf32>
    %29 = arith.subf %0, %9 : vector<8x128xf32>
    %30 = arith.mulf %29, %26 : vector<8x128xf32>
    %31 = vector.broadcast %27 : vector<1x128xf32> to vector<8x128xf32>
    %32 = arith.mulf %30, %31 : vector<8x128xf32>
    %33 = vector.broadcast %28 : vector<1x128xf32> to vector<8x128xf32>
    %34 = arith.addf %32, %33 : vector<8x128xf32>
    %c0_14 = arith.constant 0 : index
    %c0_15 = arith.constant 0 : index
    %35 = vector.load %arg5[%c0_14, %c0_15] : memref<8x128xf32, #tpu.memory_space<vmem>>, vector<8x128xf32>
    tpu.vector_store %arg5[%c0_14, %c0_15], %34 {strides = array<i32>} : memref<8x128xf32, #tpu.memory_space<vmem>>, vector<8x128xf32>,
    return
  }
  func.func @transform_0(%arg0: i32) -> (i32, i32) {
    %c0_i32 = arith.constant 0 : i32
    %c0_i32_0 = arith.constant 0 : i32
    return %arg0, %c0_i32 : i32, i32
  }
  func.func @transform_1(%arg0: i32) -> (i32, i32) {
    %c0_i32 = arith.constant 0 : i32
    %c0_i32_0 = arith.constant 0 : i32
    %c0_i32_1 = arith.constant 0 : i32
    return %c0_i32, %c0_i32_0 : i32, i32
  }
  func.func @transform_2(%arg0: i32) -> (i32, i32) {
    %c0_i32 = arith.constant 0 : i32
    %c0_i32_0 = arith.constant 0 : i32
    %c0_i32_1 = arith.constant 0 : i32
    return %c0_i32, %c0_i32_0 : i32, i32
  }
  func.func @transform_3(%arg0: i32) -> (i32, i32) {
    %c0_i32 = arith.constant 0 : i32
    %c0_i32_0 = arith.constant 0 : i32
    %c0_i32_1 = arith.constant 0 : i32
    return %c0_i32, %c0_i32_0 : i32, i32
  }
  func.func @transform_4(%arg0: i32) -> (i32, i32) {
    %c0_i32 = arith.constant 0 : i32
    %c0_i32_0 = arith.constant 0 : i32
    return %arg0, %c0_i32 : i32, i32
  }
}

</mosaic_0001>

<bundles_post_ra>
// kernel: tpu_custom_call.1
= control target key start
LH: loop header
LB: loop body
LE: loop exit
PB: predicated region body
PF: predicated region fallthrough
CT: control target
= control target key end

     0   :  { %9 = vsyncpa [#allocation3], 0  ;;  %s925_s0 = inlined_call_operand.hbm [shape: f32[8,128], index: 0, kind: input, shape index: {}]   ;;  %s926_s1 = inlined_call_operand.vmem [shape: f32[1,128], index: 1, kind: input, shape index: {}]   ;;  %s927_s2 = inlined_call_operand.vmem [shape: f32[1,128], index: 2, kind: input, shape index: {}]   ;;  %s928_s3 = inlined_call_operand.hbm [shape: f32[128,128], index: 3, kind: input, shape index: {}]   ;;  %s929_s4 = inlined_call_operand.hbm [shape: f32[8,128], index: 4, kind: output, shape index: {}]  }
   0x1   :  { %10 = vsyncpa [#allocation6], 0 }
   0x2   :  { %11 = vsyncpa [#allocation4], 0  ;;  %s783_s15 = smov [#allocation2]   ;;  %s784_s17 = smov [#allocation5]  }
   0x3   :  { %s18_s16 = sshll.u32 %s783_s15, 4  ;;  %s31_s18 = sshll.u32 %s784_s17, 4  ;;  %s19_s16 = int_to_ptr.vmem [resolvable:$true] %s18_s16  ;;  %s816_s18 = int_to_ptr.vmem [resolvable:$true] %s31_s18 }
   0x4   :  { %s711_s21 = scalar_lea.hbm %s925_s0, 128 }
   0x5   :  { %p712_p0 = scmp.ne.s32.totalorder %s925_s0, %s711_s21  ;;  %p715_p1 = scmp.lt.u32.totalorder %s711_s21, %s925_s0 }
   0x7   :  { %p717_p2 = pnand %p715_p1, %p712_p0 }
   0x9   :  { %720 = shalt.err (!%p717_p2)
}
   0xa   :  { %s721_s26 = scalar_lea.vmem %s19_s16, 128  ;;  %p726_p4 = scmp.lt.s32.totalorder %s19_s16, %s19_s16 }
   0xb   :  { %p722_p3 = scmp.ne.s32.totalorder %s19_s16, %s721_s26  ;;  %p727_p5 = scmp.lt.s32.totalorder %s721_s26, %s721_s26 }
   0xd   :  { %p728_p6 = por %p727_p5, %p726_p4 }
   0xf   :  { %p729_p7 = pnand %p728_p6, %p722_p3 }
  0x11   :  { %732 = shalt.err (!%p729_p7)
}
  0x12   :  { %21 = dma.hbm_to_vmem [thread:$0]  %s925_s0, 128, %s19_s16, [#allocation3]  }
  0x13   :  { %s733_s5 = scalar_lea.hbm %s928_s3, 2048 }
  0x14   :  { %p734_p8 = scmp.ne.s32.totalorder %s928_s3, %s733_s5  ;;  %p737_p9 = scmp.lt.u32.totalorder %s733_s5, %s928_s3 }
  0x16   :  { %p739_p10 = pnand %p737_p9, %p734_p8 }
  0x18   :  { %742 = shalt.err (!%p739_p10)
}
  0x19   :  { %s743_s10 = scalar_lea.vmem %s816_s18, 2048  ;;  %p748_p12 = scmp.lt.s32.totalorder %s816_s18, %s816_s18 }
  0x1a   :  { %p744_p11 = scmp.ne.s32.totalorder %s816_s18, %s743_s10  ;;  %p749_p13 = scmp.lt.s32.totalorder %s743_s10, %s743_s10 }
  0x1c   :  { %p750_p0 = por %p749_p13, %p748_p12 }
  0x1e   :  { %p751_p1 = pnand %p750_p0, %p744_p11 }
  0x20   :  { %754 = shalt.err (!%p751_p1)
}
  0x21   :  { %s785_s0 = smov 128   ;;  %s786_s11 = smov 8  }
  0x22   :  { %37 = dma.hbm_to_vmem [thread:$0]  %s928_s3, 2048, %s816_s18, [#allocation6], %s785_s0, %s785_s0, %s786_s11  }
  0x23   :  { %777 = dma.done.wait [#allocation3], 128  }
  0x24   :  { %778 = vsyncadd [#allocation3], 4294967168 }
  0x25   :  { %779 = dma.done.wait [#allocation6], 2048  }
  0x26   :  { %780 = vsyncadd [#allocation6], 4294965248  ;;  %v787_v0 = vmov 0.0|0.0   ;;  %vm788_vm0 = vmmov 0   ;;  %v789_v1 = vmov 0.0   ;;  %v45_v2 = vld [vmem:[#allocation5] sm:$0xff] }
  0x27   :  { %601 = vmatprep.subr.bf16.mxu0 %v787_v0  ;;  %649 = vmatprep.subr.bf16.mxu1 %v787_v0  ;;  %v46_v3 = vld [vmem:[#allocation5 + $0x8] sm:$0xff]  ;;  %v47_v4 = vld [vmem:[#allocation5 + $0x10] sm:$0xff]  ;;  %v48_v6 = vld [vmem:[#allocation5 + $0x18] sm:$0xff]  ;;  %s790_s17 = smov [#allocation7]  }
  0x28   :  { %493 = vmatprep.mubr.msk.f32.mxu0 %vm788_vm0, %v789_v1  ;;  %563 = vmatprep.mubr.msk.f32.mxu1 %vm788_vm0, %v789_v1  ;;  %v853_v5 = vpack.c.bf16 %v46_v3, %v45_v2  ;;  %v857_v7 = vpack.c.bf16 %v48_v6, %v47_v4  ;;  %v49_v8 = vld [vmem:[#allocation5 + $0x20] sm:$0xff]  ;;  %v50_v9 = vld [vmem:[#allocation5 + $0x28] sm:$0xff]  ;;  %v51_v11 = vld [vmem:[#allocation5 + $0x30] sm:$0xff]  ;;  %s381_s18 = sshll.u32 %s790_s17, 4  ;;  %s382_s18 = int_to_ptr.vmem [resolvable:$true] %s381_s18 }
  0x29   :  { %v608_v10 = vpack.c.bf16 %v50_v9, %v49_v8  ;;  %v52_v12 = vld [vmem:[#allocation5 + $0x38] sm:$0xff]  ;;  %v53_v14 = vld [vmem:[#allocation5 + $0x40] sm:$0xff]  ;;  %v54_v15 = vld [vmem:[#allocation5 + $0x48] sm:$0xff]  ;;  %s755_s19 = scalar_lea.vmem %s382_s18, 128  ;;  %p760_p3 = scmp.lt.s32.totalorder %s382_s18, %s382_s18 }
  0x2a   :  { %603 = vmatpush3.bf16.msra.mxu0 %v853_v5  ;;  %651 = vmatpush3.bf16.msra.mxu1 %v853_v5  ;;  %v611_v13 = vpack.c.bf16 %v52_v12, %v51_v11  ;;  %v614_v16 = vpack.c.bf16 %v54_v15, %v53_v14  ;;  %v867_v17 = vld [vmem:[#allocation2] sm:$0xff]  ;;  %v55_v18 = vld [vmem:[#allocation5 + $0x50] sm:$0xff]  ;;  %v57_v22 = vld [vmem:[#allocation5 + $0x60] sm:$0xff]  ;;  %p756_p2 = scmp.ne.s32.totalorder %s382_s18, %s755_s19  ;;  %p761_p4 = scmp.lt.s32.totalorder %s755_s19, %s755_s19 }
  0x2b   :  { %604 = vmatprep.subr.bf16.mxu0 %v787_v0  ;;  %652 = vmatprep.subr.bf16.mxu1 %v787_v0  ;;  %v56_v19 = vld [vmem:[#allocation5 + $0x58] sm:$0xff]  ;;  %v205_v20 = vmul.f32 %v867_v17, %v867_v17  ;;  %v58_v23 = vld [vmem:[#allocation5 + $0x68] sm:$0xff]  ;;  %v61_v24 = vpack.c.bf16 %v867_v17, %v867_v17  ;;  %v59_v27 = vld [vmem:[#allocation5 + $0x70] sm:$0xff] }
  0x2c   :  { %v617_v21 = vpack.c.bf16 %v56_v19, %v55_v18  ;;  %v620_v26 = vpack.c.bf16 %v58_v23, %v57_v22  ;;  %v60_v28 = vld [vmem:[#allocation5 + $0x78] sm:$0xff]  ;;  %p762_p5 = por %p761_p4, %p760_p3 }
  0x2d   :  { %v206_v25 = vpack.c.bf16 %v205_v20, %v205_v20  ;;  %v62_v29 = vunpack.c.l.bf16 %v61_v24  ;;  %v623_v31 = vpack.c.bf16 %v60_v28, %v59_v27  ;;  %v391_v47 = vld [vmem:[%s926_s1] ss:$0 sm:$0xff] }
  0x2e   :  { %606 = vmatpush3.bf16.msra.mxu0 %v857_v7  ;;  %654 = vmatpush3.bf16.msra.mxu1 %v857_v7  ;;  %v392_v49 = vld [vmem:[%s927_s2] ss:$0 sm:$0xff]  ;;  %p763_p6 = pnand %p762_p5, %p756_p2 }
  0x2f   :  { %607 = vmatprep.subr.bf16.mxu0 %v787_v0  ;;  %655 = vmatprep.subr.bf16.mxu1 %v787_v0  ;;  %v207_v30 = vunpack.c.l.bf16 %v206_v25  ;;  %v63_v32 = vsub.f32 %v867_v17, %v62_v29 }
  0x31   :  { %v208_v33 = vsub.f32 %v205_v20, %v207_v30 }
  0x32   :  { %609 = vmatpush3.bf16.msra.mxu0 %v608_v10  ;;  %657 = vmatpush3.bf16.msra.mxu1 %v608_v10 }
  0x33   :  { %610 = vmatprep.subr.bf16.mxu0 %v787_v0  ;;  %658 = vmatprep.subr.bf16.mxu1 %v787_v0 }
  0x36   :  { %612 = vmatpush3.bf16.msra.mxu0 %v611_v13  ;;  %660 = vmatpush3.bf16.msra.mxu1 %v611_v13 }
  0x37   :  { %613 = vmatprep.subr.bf16.mxu0 %v787_v0  ;;  %661 = vmatprep.subr.bf16.mxu1 %v787_v0 }
  0x3a   :  { %615 = vmatpush3.bf16.msra.mxu0 %v614_v16  ;;  %663 = vmatpush3.bf16.msra.mxu1 %v614_v16 }
  0x3b   :  { %616 = vmatprep.subr.bf16.mxu0 %v787_v0  ;;  %664 = vmatprep.subr.bf16.mxu1 %v787_v0 }
  0x3e   :  { %618 = vmatpush3.bf16.msra.mxu0 %v617_v21  ;;  %666 = vmatpush3.bf16.msra.mxu1 %v617_v21 }
  0x3f   :  { %619 = vmatprep.subr.bf16.mxu0 %v787_v0  ;;  %667 = vmatprep.subr.bf16.mxu1 %v787_v0 }
  0x42   :  { %621 = vmatpush3.bf16.msra.mxu0 %v620_v26  ;;  %669 = vmatpush3.bf16.msra.mxu1 %v620_v26 }
  0x43   :  { %622 = vmatprep.subr.bf16.mxu0 %v787_v0  ;;  %670 = vmatprep.subr.bf16.mxu1 %v787_v0 }
  0x46   :  { %624 = vmatpush3.bf16.msra.mxu0 %v623_v31  ;;  %672 = vmatpush3.bf16.msra.mxu1 %v623_v31 }
  0x47   :  { %625 = vmatprep.subr.bf16.mxu0 %v787_v0  ;;  %673 = vmatprep.subr.bf16.mxu1 %v787_v0 }
  0x49   :  { %494 = vmatmul.mubr.f32.vlgmr.msra.gmra.mrb[0].mxu0 %v63_v32  ;;  %564 = vmatmul.mubr.f32.vlgmr.msra.gmra.mrb[0].mxu1 %v208_v33 }
  0x4a   :  { %627 = vmatpush3.bf16.msra.mxu0 %v853_v5  ;;  %675 = vmatpush3.bf16.msra.mxu1 %v853_v5 }
  0x4b   :  { %628 = vmatprep.subr.bf16.mxu0 %v787_v0  ;;  %676 = vmatprep.subr.bf16.mxu1 %v787_v0 }
  0x4c   :  { %528 = vmatprep.mubr.msk.f32.mxu0 %vm788_vm0, %v789_v1  ;;  %598 = vmatprep.mubr.msk.f32.mxu1 %vm788_vm0, %v789_v1 }
  0x4e   :  { %630 = vmatpush3.bf16.msra.mxu0 %v857_v7  ;;  %678 = vmatpush3.bf16.msra.mxu1 %v857_v7 }
  0x4f   :  { %631 = vmatprep.subr.bf16.mxu0 %v787_v0  ;;  %679 = vmatprep.subr.bf16.mxu1 %v787_v0 }
  0x52   :  { %633 = vmatpush3.bf16.msra.mxu0 %v608_v10  ;;  %681 = vmatpush3.bf16.msra.mxu1 %v608_v10 }
  0x53   :  { %634 = vmatprep.subr.bf16.mxu0 %v787_v0  ;;  %682 = vmatprep.subr.bf16.mxu1 %v787_v0 }
  0x56   :  { %636 = vmatpush3.bf16.msra.mxu0 %v611_v13  ;;  %684 = vmatpush3.bf16.msra.mxu1 %v611_v13 }
  0x57   :  { %637 = vmatprep.subr.bf16.mxu0 %v787_v0  ;;  %685 = vmatprep.subr.bf16.mxu1 %v787_v0 }
  0x5a   :  { %639 = vmatpush3.bf16.msra.mxu0 %v614_v16  ;;  %687 = vmatpush3.bf16.msra.mxu1 %v614_v16 }
  0x5b   :  { %640 = vmatprep.subr.bf16.mxu0 %v787_v0  ;;  %688 = vmatprep.subr.bf16.mxu1 %v787_v0 }
  0x5e   :  { %642 = vmatpush3.bf16.msra.mxu0 %v617_v21  ;;  %690 = vmatpush3.bf16.msra.mxu1 %v617_v21 }
  0x5f   :  { %643 = vmatprep.subr.bf16.mxu0 %v787_v0  ;;  %691 = vmatprep.subr.bf16.mxu1 %v787_v0 }
  0x62   :  { %645 = vmatpush3.bf16.msra.mxu0 %v620_v26  ;;  %693 = vmatpush3.bf16.msra.mxu1 %v620_v26 }
  0x63   :  { %646 = vmatprep.subr.bf16.mxu0 %v787_v0  ;;  %694 = vmatprep.subr.bf16.mxu1 %v787_v0 }
  0x66   :  { %648 = vmatpush3.bf16.msra.mxu0 %v623_v31  ;;  %696 = vmatpush3.bf16.msra.mxu1 %v623_v31 }
  0x69   :  { %529 = vmatmul.mubr.f32.vlgmr.msra.gmra.mrb[0].mxu0 %v62_v29  ;;  %599 = vmatmul.mubr.f32.vlgmr.msra.gmra.mrb[0].mxu1 %v207_v30 }
 0x13c   :  { %v200_v34 = vpop.f32.mrb[0].mxu0  ;;  %v345_v35 = vpop.f32.mrb[0].mxu1 }
 0x13d   :  { %v204_v36 = vmul.f32 0.03125, %v200_v34  ;;  %v530_v37 = vpop.f32.mrb[1].mxu0  ;;  %v600_v38 = vpop.f32.mrb[1].mxu1  ;;  %v349_v40 = vmul.f32 0.03125, %v345_v35 }
 0x13f   :  { %v350_v39 = vmul.f32 %v204_v36, %v204_v36  ;;  %v358_v45 = vsub.f32 %v867_v17, %v204_v36 }
 0x141   :  { %v351_v41 = vsub.f32 %v349_v40, %v350_v39 }
 0x143   :  { %v352_v42 = vmax.f32 %v351_v41, 0.0 }
 0x145   :  { %v353_v43 = vadd.f32 1e-12, %v352_v42 }
 0x147   :  { %v354_v44 = vmul.f32 %v353_v43, %v353_v43 }
 0x149   :  { %709 = vrcp.f32 %v354_v44 }
 0x153   :  { %v710_v46 = vpop.eup %709 }
 0x154   :  { %v359_v48 = vmul.f32 %v710_v46, %v358_v45 }
 0x156   :  { %v366_v50 = vmul.f32 %v391_v47, %v359_v48 }
 0x158   :  { %v373_v51 = vadd.f32 %v392_v49, %v366_v50 }
 0x15a   :  { %374 = vst [vmem:[#allocation7] sm:$0xff] %v373_v51 }
 0x15b   :  { %766 = shalt.err (!%p763_p6)
}
 0x15c   :  { %s767_s21 = scalar_lea.hbm %s929_s4, 128 }
 0x15d   :  { %p768_p7 = scmp.ne.s32.totalorder %s929_s4, %s767_s21  ;;  %p771_p8 = scmp.lt.u32.totalorder %s767_s21, %s929_s4 }
 0x15f   :  { %p773_p9 = pnand %p771_p8, %p768_p7 }
 0x161   :  { %776 = shalt.err (!%p773_p9)
}
 0x162   :  { %384 = dma.vmem_to_hbm [thread:$0]  %s382_s18, 128, %s929_s4, [#allocation4]  }
 0x163   :  { %781 = dma.done.wait [#allocation4], 128  }
 0x164   :  { %782 = vsyncadd [#allocation4], 4294967168 }
 0x165   :  { %388 = vsyncpa [#allocation3], 1 }
 0x166   :  { %389 = vsyncpa [#allocation6], 1 }
 0x167   :  { %390 = vsyncpa [#allocation4], 1 }

</bundles_post_ra>
